<compile_context>
chip_gen: v6e
topology: v6e:2x2x1
jax: 0.10.0
libtpu: 0.0.40
codegen_flags: <defaults>
</compile_context>

<pallas_src>
import functools

import jax
import jax.numpy as jnp
from jax import lax
from jax.experimental import pallas as pl
from jax.experimental.pallas import tpu as pltpu


def _make_decoder_kernel(n_cat: int, n_output: int, use_lib: bool, neg_slope: float = 0.01):
    def kernel(z_ref, lab_ref, *refs):
        if use_lib:
            lib_ref, w1z_ref, w1c_ref, b1_ref, w2_ref, b2_ref, o_ref = refs
        else:
            w1z_ref, w1c_ref, b1_ref, w2_ref, b2_ref, o_ref = refs

        z = z_ref[...].astype(jnp.float32)          # (tb, n_in)
        lab = lab_ref[...]                          # (tb, 1) int32
        tb = z.shape[0]

        # one_hot(cat, n_cat) built in-register (covariate injection into layer 0).
        onehot = (lax.broadcasted_iota(jnp.int32, (tb, n_cat), 1) == lab).astype(jnp.float32)

        # Layer 0: Linear(n_in + n_cat, n_hidden) split as two matmuls (no concat copy).
        h = jnp.dot(z, w1z_ref[...].astype(jnp.float32),
                    preferred_element_type=jnp.float32)
        h = h + jnp.dot(onehot, w1c_ref[...].astype(jnp.float32),
                        preferred_element_type=jnp.float32)
        h = h + b1_ref[...].astype(jnp.float32)

        # LeakyReLU(0.01). Dropout(p=0.1) is identity in eval mode.
        h = jnp.where(h > 0, h, jnp.float32(neg_slope) * h)

        # Output head: Linear(n_hidden, n_output).
        y = jnp.dot(h, w2_ref[...].astype(jnp.float32),
                    preferred_element_type=jnp.float32)
        y = y + b2_ref[...].astype(jnp.float32)

        if use_lib:
            # torch.logit(exp(lib) / n_output, eps=1e-7): clamp then log(p / (1 - p)).
            lib = lib_ref[...].astype(jnp.float32)  # (tb, 1)
            p = jnp.exp(lib) / jnp.float32(n_output)
            p = jnp.clip(p, jnp.float32(1e-7), jnp.float32(1.0 - 1e-7))
            y = y + jnp.log(p / (jnp.float32(1.0) - p))

        # Sigmoid (Bernoulli rate).
        o_ref[...] = (1.0 / (1.0 + jnp.exp(-y))).astype(o_ref.dtype)

    return kernel


def decoder_binary_vae_forward(z, cat_labels, lib, params, *, n_output, tile_b=None):
    """z: (B, n_input) f32, cat_labels: (B,) int, lib: (B, 1) f32 or None,
    params = (w1_z (n_in, n_hidden), w1_c (n_cat, n_hidden), b1 (n_hidden,),
              w2 (n_hidden, n_output), b2 (n_output,))."""
    w1_z, w1_c, b1, w2, b2 = params
    B, n_in = z.shape
    n_cat, n_hidden = w1_c.shape

    if tile_b is None:
        tile_b = min(B, 512)
    assert B % tile_b == 0, "batch must be divisible by tile_b"
    grid = (B // tile_b,)

    lab2d = cat_labels.astype(jnp.int32).reshape(B, 1)
    use_lib = lib is not None

    in_arrays = [z, lab2d]
    in_specs = [
        pl.BlockSpec((tile_b, n_in), lambda i: (i, 0)),
        pl.BlockSpec((tile_b, 1), lambda i: (i, 0)),
    ]
    if use_lib:
        in_arrays.append(lib.reshape(B, 1).astype(jnp.float32))
        in_specs.append(pl.BlockSpec((tile_b, 1), lambda i: (i, 0)))

    # Weights/biases: constant index_map -> resident in VMEM across all batch tiles.
    in_arrays += [w1_z, w1_c, b1.reshape(1, n_hidden), w2, b2.reshape(1, n_output)]
    in_specs += [
        pl.BlockSpec((n_in, n_hidden), lambda i: (0, 0)),
        pl.BlockSpec((n_cat, n_hidden), lambda i: (0, 0)),
        pl.BlockSpec((1, n_hidden), lambda i: (0, 0)),
        pl.BlockSpec((n_hidden, n_output), lambda i: (0, 0)),
        pl.BlockSpec((1, n_output), lambda i: (0, 0)),
    ]

    flops = 2 * B * (n_in * n_hidden + n_cat * n_hidden + n_hidden * n_output)
    transcendentals = B * n_output + (3 * B if use_lib else 0)
    bytes_accessed = 4 * (
        B * (n_in + 1 + 1 + n_output)
        + n_in * n_hidden + n_cat * n_hidden + n_hidden + n_hidden * n_output + n_output
    )

    kernel = _make_decoder_kernel(n_cat, n_output, use_lib)

    return pl.pallas_call(
        kernel,
        out_shape=jax.ShapeDtypeStruct((B, n_output), jnp.float32),
        grid=grid,
        in_specs=in_specs,
        out_specs=pl.BlockSpec((tile_b, n_output), lambda i: (i, 0)),
        compiler_params=pltpu.CompilerParams(
            dimension_semantics=("parallel",),
            vmem_limit_bytes=32 * 1024 * 1024,
        ),
        cost_estimate=pl.CostEstimate(
            flops=flops,
            transcendentals=transcendentals,
            bytes_accessed=bytes_accessed,
        ),
    )(*in_arrays)


def decoder_binary_vae_ref(z, cat_labels, lib, params, *, n_output):
    """Pure-JAX reference mirroring the PyTorch forward (eval mode)."""
    w1_z, w1_c, b1, w2, b2 = params
    onehot = jax.nn.one_hot(cat_labels, w1_c.shape[0], dtype=jnp.float32)
    h = z @ w1_z + onehot @ w1_c + b1
    h = jnp.where(h > 0, h, 0.01 * h)
    y = h @ w2 + b2
    if lib is not None:
        p = jnp.clip(jnp.exp(lib.reshape(-1, 1)) / n_output, 1e-7, 1.0 - 1e-7)
        y = y + jnp.log(p / (1.0 - p))
    return 1.0 / (1.0 + jnp.exp(-y))


if __name__ == "__main__":
    # Small shapes consistent with the module defaults:
    # batch=16, n_input=32 (latent), n_hidden=128, n_output=256 (lane-dense), 1 cat covariate w/ 4 cats.
    B, n_input, n_hidden, n_output, n_cat = 16, 32, 128, 256, 4

    key = jax.random.PRNGKey(0)
    ks = jax.random.split(key, 8)

    z = jax.random.normal(ks[0], (B, n_input), dtype=jnp.float32)
    cat_labels = jax.random.randint(ks[1], (B,), 0, n_cat, dtype=jnp.int32)
    lib = jnp.log(jax.random.uniform(ks[2], (B, 1), minval=10.0, maxval=200.0,
                                     dtype=jnp.float32))

    w1_z = jax.random.normal(ks[3], (n_input, n_hidden), dtype=jnp.float32) * 0.1
    w1_c = jax.random.normal(ks[4], (n_cat, n_hidden), dtype=jnp.float32) * 0.1
    b1 = jax.random.normal(ks[5], (n_hidden,), dtype=jnp.float32) * 0.1
    w2 = jax.random.normal(ks[6], (n_hidden, n_output), dtype=jnp.float32) * 0.1
    b2 = jax.random.normal(ks[7], (n_output,), dtype=jnp.float32) * 0.1
    params = (w1_z, w1_c, b1, w2, b2)

    out = decoder_binary_vae_forward(z, cat_labels, lib, params,
                                     n_output=n_output, tile_b=8)
    out = jax.block_until_ready(out)

    expected = decoder_binary_vae_ref(z, cat_labels, lib, params, n_output=n_output)
    assert out.shape == (B, n_output)
    assert jnp.allclose(out, expected, rtol=1e-5, atol=1e-5), (
        float(jnp.max(jnp.abs(out - expected))))

    # Also exercise the lib=None branch.
    out2 = jax.block_until_ready(
        decoder_binary_vae_forward(z, cat_labels, None, params,
                                   n_output=n_output, tile_b=8))
    expected2 = decoder_binary_vae_ref(z, cat_labels, None, params, n_output=n_output)
    assert jnp.allclose(out2, expected2, rtol=1e-5, atol=1e-5), (
        float(jnp.max(jnp.abs(out2 - expected2))))

    print("KERNEL_OK")
</pallas_src>

<mosaic_0001>
module attributes {stable_mosaic.version = 11 : i64} {
  func.func @kernel(%arg0: i32, %arg1: memref<8x32xf32, #tpu.memory_space<vmem>>, %arg2: memref<8x1xi32, #tpu.memory_space<vmem>>, %arg3: memref<8x1xf32, #tpu.memory_space<vmem>>, %arg4: memref<32x128xf32, #tpu.memory_space<vmem>>, %arg5: memref<4x128xf32, #tpu.memory_space<vmem>>, %arg6: memref<1x128xf32, #tpu.memory_space<vmem>>, %arg7: memref<128x256xf32, #tpu.memory_space<vmem>>, %arg8: memref<1x256xf32, #tpu.memory_space<vmem>>, %arg9: memref<8x256xf32, #tpu.memory_space<vmem>>) attributes {dimension_semantics = [#tpu.dimension_semantics<parallel>], iteration_bounds = array<i64: 2>, scalar_prefetch = 0 : i64, scratch_operands = 0 : i64, tpu.core_type = #tpu.core_type<tc>, window_params = [{transform_indices = @transform_0, window_bounds = array<i64: 8, 32>}, {transform_indices = @transform_1, window_bounds = array<i64: 8, 1>}, {transform_indices = @transform_2, window_bounds = array<i64: 8, 1>}, {pipeline_mode = #tpu.pipeline_mode<synchronous>, transform_indices = @transform_3, window_bounds = array<i64: 32, 128>}, {pipeline_mode = #tpu.pipeline_mode<synchronous>, transform_indices = @transform_4, window_bounds = array<i64: 4, 128>}, {pipeline_mode = #tpu.pipeline_mode<synchronous>, transform_indices = @transform_5, window_bounds = array<i64: 1, 128>}, {pipeline_mode = #tpu.pipeline_mode<synchronous>, transform_indices = @transform_6, window_bounds = array<i64: 128, 256>}, {pipeline_mode = #tpu.pipeline_mode<synchronous>, transform_indices = @transform_7, window_bounds = array<i64: 1, 256>}, {transform_indices = @transform_8, window_bounds = array<i64: 8, 256>}]} {
    %c0 = arith.constant 0 : index
    %c0_0 = arith.constant 0 : index
    %0 = vector.load %arg1[%c0, %c0_0] : memref<8x32xf32, #tpu.memory_space<vmem>>, vector<8x32xf32>
    %c0_1 = arith.constant 0 : index
    %c0_2 = arith.constant 0 : index
    %1 = vector.load %arg2[%c0_1, %c0_2] : memref<8x1xi32, #tpu.memory_space<vmem>>, vector<8x1xi32>
    %2 = tpu.iota {dimensions = array<i32: 1>} : vector<8x4xi32>
    %3 = vector.broadcast %1 : vector<8x1xi32> to vector<8x4xi32>
    %4 = arith.cmpi eq, %2, %3 : vector<8x4xi32>
    %5 = arith.extui %4 : vector<8x4xi1> to vector<8x4xi32>
    %6 = arith.sitofp %5 : vector<8x4xi32> to vector<8x4xf32>
    %c0_3 = arith.constant 0 : index
    %c0_4 = arith.constant 0 : index
    %7 = vector.load %arg4[%c0_3, %c0_4] : memref<32x128xf32, #tpu.memory_space<vmem>>, vector<32x128xf32>
    %cst = arith.constant dense<0.000000e+00> : vector<8x128xf32>
    %8 = tpu.matmul %0, %7, %cst {dimension_numbers = #tpu.dot_dimension_numbers<[1], [0], [0], [1], [0, 0, 1, 1], [], []>} : vector<8x32xf32>, vector<32x128xf32>, vector<8x128xf32> -> vector<8x128xf32>
    %c0_5 = arith.constant 0 : index
    %c0_6 = arith.constant 0 : index
    %9 = vector.load %arg5[%c0_5, %c0_6] : memref<4x128xf32, #tpu.memory_space<vmem>>, vector<4x128xf32>
    %cst_7 = arith.constant dense<0.000000e+00> : vector<8x128xf32>
    %10 = tpu.matmul %6, %9, %cst_7 {dimension_numbers = #tpu.dot_dimension_numbers<[1], [0], [0], [1], [0, 0, 1, 1], [], []>} : vector<8x4xf32>, vector<4x128xf32>, vector<8x128xf32> -> vector<8x128xf32>
    %11 = arith.addf %8, %10 : vector<8x128xf32>
    %c0_8 = arith.constant 0 : index
    %c0_9 = arith.constant 0 : index
    %12 = vector.load %arg6[%c0_8, %c0_9] : memref<1x128xf32, #tpu.memory_space<vmem>>, vector<1x128xf32>
    %13 = vector.broadcast %12 : vector<1x128xf32> to vector<8x128xf32>
    %14 = arith.addf %11, %13 : vector<8x128xf32>
    %cst_10 = arith.constant 0.000000e+00 : f32
    %15 = vector.broadcast %cst_10 : f32 to vector<8x128xf32>
    %16 = arith.cmpf ogt, %14, %15 : vector<8x128xf32>
    %cst_11 = arith.constant 0.00999999977 : f32
    %17 = vector.broadcast %cst_11 : f32 to vector<8x128xf32>
    %18 = arith.mulf %17, %14 : vector<8x128xf32>
    %19 = arith.select %16, %14, %18 : vector<8x128xi1>, vector<8x128xf32>
    %c0_12 = arith.constant 0 : index
    %c0_13 = arith.constant 0 : index
    %20 = vector.load %arg7[%c0_12, %c0_13] : memref<128x256xf32, #tpu.memory_space<vmem>>, vector<128x256xf32>
    %cst_14 = arith.constant dense<0.000000e+00> : vector<8x256xf32>
    %21 = tpu.matmul %19, %20, %cst_14 {dimension_numbers = #tpu.dot_dimension_numbers<[1], [0], [0], [1], [0, 0, 1, 1], [], []>} : vector<8x128xf32>, vector<128x256xf32>, vector<8x256xf32> -> vector<8x256xf32>
    %c0_15 = arith.constant 0 : index
    %c0_16 = arith.constant 0 : index
    %22 = vector.load %arg8[%c0_15, %c0_16] : memref<1x256xf32, #tpu.memory_space<vmem>>, vector<1x256xf32>
    %23 = vector.broadcast %22 : vector<1x256xf32> to vector<8x256xf32>
    %24 = arith.addf %21, %23 : vector<8x256xf32>
    %c0_17 = arith.constant 0 : index
    %c0_18 = arith.constant 0 : index
    %25 = vector.load %arg3[%c0_17, %c0_18] : memref<8x1xf32, #tpu.memory_space<vmem>>, vector<8x1xf32>
    %26 = math.exp %25 : vector<8x1xf32>
    %cst_19 = arith.constant 2.560000e+02 : f32
    %27 = vector.broadcast %cst_19 : f32 to vector<8x1xf32>
    %28 = arith.divf %26, %27 : vector<8x1xf32>
    %cst_20 = arith.constant 1.000000e-07 : f32
    %cst_21 = arith.constant 0.99999988 : f32
    %29 = vector.broadcast %cst_20 : f32 to vector<8x1xf32>
    %30 = arith.maximumf %29, %28 : vector<8x1xf32>
    %31 = vector.broadcast %cst_21 : f32 to vector<8x1xf32>
    %32 = arith.minimumf %31, %30 : vector<8x1xf32>
    %cst_22 = arith.constant 1.000000e+00 : f32
    %33 = vector.broadcast %cst_22 : f32 to vector<8x1xf32>
    %34 = arith.subf %33, %32 : vector<8x1xf32>
    %35 = arith.divf %32, %34 : vector<8x1xf32>
    %36 = math.log %35 : vector<8x1xf32>
    %37 = vector.broadcast %36 : vector<8x1xf32> to vector<8x256xf32>
    %38 = arith.addf %24, %37 : vector<8x256xf32>
    %cst_23 = arith.constant 0.000000e+00 : f32
    %39 = vector.broadcast %cst_23 : f32 to vector<8x256xf32>
    %40 = arith.subf %39, %38 : vector<8x256xf32>
    %41 = math.exp %40 : vector<8x256xf32>
    %cst_24 = arith.constant 1.000000e+00 : f32
    %42 = vector.broadcast %cst_24 : f32 to vector<8x256xf32>
    %43 = arith.addf %42, %41 : vector<8x256xf32>
    %cst_25 = arith.constant 1.000000e+00 : f32
    %44 = vector.broadcast %cst_25 : f32 to vector<8x256xf32>
    %45 = arith.divf %44, %43 : vector<8x256xf32>
    %c0_26 = arith.constant 0 : index
    %c0_27 = arith.constant 0 : index
    %46 = vector.load %arg9[%c0_26, %c0_27] : memref<8x256xf32, #tpu.memory_space<vmem>>, vector<8x256xf32>
    tpu.vector_store %arg9[%c0_26, %c0_27], %45 {strides = array<i32>} : memref<8x256xf32, #tpu.memory_space<vmem>>, vector<8x256xf32>,
    return
  }
  func.func @transform_0(%arg0: i32) -> (i32, i32) {
    %c0_i32 = arith.constant 0 : i32
    %c0_i32_0 = arith.constant 0 : i32
    return %arg0, %c0_i32 : i32, i32
  }
  func.func @transform_1(%arg0: i32) -> (i32, i32) {
    %c0_i32 = arith.constant 0 : i32
    %c0_i32_0 = arith.constant 0 : i32
    return %arg0, %c0_i32 : i32, i32
  }
  func.func @transform_2(%arg0: i32) -> (i32, i32) {
    %c0_i32 = arith.constant 0 : i32
    %c0_i32_0 = arith.constant 0 : i32
    return %arg0, %c0_i32 : i32, i32
  }
  func.func @transform_3(%arg0: i32) -> (i32, i32) {
    %c0_i32 = arith.constant 0 : i32
    %c0_i32_0 = arith.constant 0 : i32
    %c0_i32_1 = arith.constant 0 : i32
    return %c0_i32, %c0_i32_0 : i32, i32
  }
  func.func @transform_4(%arg0: i32) -> (i32, i32) {
    %c0_i32 = arith.constant 0 : i32
    %c0_i32_0 = arith.constant 0 : i32
    %c0_i32_1 = arith.constant 0 : i32
    return %c0_i32, %c0_i32_0 : i32, i32
  }
  func.func @transform_5(%arg0: i32) -> (i32, i32) {
    %c0_i32 = arith.constant 0 : i32
    %c0_i32_0 = arith.constant 0 : i32
    %c0_i32_1 = arith.constant 0 : i32
    return %c0_i32, %c0_i32_0 : i32, i32
  }
  func.func @transform_6(%arg0: i32) -> (i32, i32) {
    %c0_i32 = arith.constant 0 : i32
    %c0_i32_0 = arith.constant 0 : i32
    %c0_i32_1 = arith.constant 0 : i32
    return %c0_i32, %c0_i32_0 : i32, i32
  }
  func.func @transform_7(%arg0: i32) -> (i32, i32) {
    %c0_i32 = arith.constant 0 : i32
    %c0_i32_0 = arith.constant 0 : i32
    %c0_i32_1 = arith.constant 0 : i32
    return %c0_i32, %c0_i32_0 : i32, i32
  }
  func.func @transform_8(%arg0: i32) -> (i32, i32) {
    %c0_i32 = arith.constant 0 : i32
    %c0_i32_0 = arith.constant 0 : i32
    return %arg0, %c0_i32 : i32, i32
  }
}

</mosaic_0001>

<bundles_post_ra>
// kernel: tpu_custom_call.1
= control target key start
LH: loop header
LB: loop body
LE: loop exit
PB: predicated region body
PF: predicated region fallthrough
CT: control target
= control target key end

     0   :  { %s1321_s0 = inlined_call_operand.hbm [shape: f32[16,32], index: 0, kind: input, shape index: {}]   ;;  %s1322_s1 = inlined_call_operand.vmem [shape: s32[16,1], index: 1, kind: input, shape index: {}]   ;;  %s1323_s2 = inlined_call_operand.vmem [shape: f32[16,1], index: 2, kind: input, shape index: {}]   ;;  %s1324_s3 = inlined_call_operand.vmem [shape: f32[32,128], index: 3, kind: input, shape index: {}]   ;;  %s1325_s4 = inlined_call_operand.vmem [shape: f32[4,128], index: 4, kind: input, shape index: {}]   ;;  %s1326_s5 = inlined_call_operand.vmem [shape: f32[1,128], index: 5, kind: input, shape index: {}]   ;;  %s1327_s6 = inlined_call_operand.hbm [shape: f32[128,256], index: 6, kind: input, shape index: {}]   ;;  %s1328_s7 = inlined_call_operand.vmem [shape: f32[1,256], index: 7, kind: input, shape index: {}]   ;;  %s1329_s8 = inlined_call_operand.hbm [shape: f32[16,256], index: 8, kind: output, shape index: {}]  }
   0x1   :  { %1336 = sst [smem:[#allocation13_spill]] %s1327_s6 }
   0x2   :  { %13 = vsyncpa [#allocation3], 0 }
   0x3   :  { %15 = vsyncpa [#allocation3 + $0x1], 0 }
   0x4   :  { %16 = vsyncpa [#allocation6], 0 }
   0x5   :  { %17 = vsyncpa [#allocation4], 0 }
   0x6   :  { %19 = vsyncpa [#allocation4 + $0x1], 0  ;;  %s1115_s27 = smov 0   ;;  %s1117_s28 = smov 0  }
   0x7   :  { %s1119_s29 = smov 0   ;;  %s1121_s30 = smov 0  }
   0x8 LB: > { %s1136_s9 = sadd.s32 4294967295, %s1060_s30   ;;  %s815_s10 = sadd.s32 4294967294, %s1060_s30   ;;  %s1060_s30 = sphi %s1121_s30, %s1354_s30   ;;  %s1056_s29 = sphi %s1119_s29, %s1358_s29   ;;  %s1052_s28 = sphi %s1117_s28, %s1357_s28   ;;  %s1048_s27 = sphi %s1115_s27, %s1356_s27  }
   0x9   : > { %p45_p0 = scmp.ne.s32.totalorder %s1052_s28, %s1048_s27  ;;  %p1332_p1 = scmp.eq.s32.totalorder %s1136_s9, 0 }
   0xa   : > { %p232_p3 = scmp.eq.s32.totalorder %s815_s10, 1  ;;  %p816_p5 = scmp.ge.s32.totalorder %s1060_s30, 1 }
   0xb   : > { %p1145_p4 = por %p1332_p1, %p45_p0  ;;  %p239_p7 = scmp.lt.s32.totalorder %s1060_s30, 3 }
   0xc   : > { %p1150_p6 = por %p232_p3, %p45_p0  ;;  %s1062_s14 = smov [#allocation5]  }
   0xd   : > { %s1337_s11 = scalar_select %p1145_p4, 1, 0 }
   0xe   : > { %s1338_s12 = scalar_select %p1150_p6, 1, 0 }
   0xf   : > { %p1155_p8 = pnand %p816_p5, %p239_p7  ;;  %s260_s15 = sshll.u32 %s1062_s14, 4  ;;  %s261_s15 = int_to_ptr.vmem [resolvable:$true] %s260_s15 }
  0x10   : > { %s1169_s17 = sadd.s32 1, %s1060_s30   ;;  %s32_s18 = sadd.s32 1, %s1056_s29 }
  0x11   : > { %s1339_s13 = scalar_select %p1155_p8, 1, 0 }
  0x12   : > { %p869_p9 = pneg %p1155_p8  ;;  %1341 = sst [smem:[#allocation11_spill]] %s1169_s17 }
  0x13   : > { %s29_s19 = ssub.s32 %s1060_s30, %s1169_s17  ;;  %s949_s20 = scalar_lea.vmem %s261_s15, 4096 }
  0x14   : > { %p1164_p11 = pnand %p869_p9, %p1332_p1  ;;  %p950_p13 = scmp.ne.s32.totalorder %s261_s15, %s949_s20 }
  0x15   : > { %p957_p5 = scmp.lt.s32.totalorder %s261_s15, %s261_s15  ;;  %p958_p7 = scmp.lt.s32.totalorder %s949_s20, %s949_s20 }
  0x16   : > { %p940_p12 = pneg %p1164_p11 }
  0x17   : > { %p959_p10 = por %p958_p7, %p957_p5 }
  0x18   : > { %p952_p0 = pnand %p950_p13, %p940_p12 }
  0x1a   : > { %p953_p3 = pneg %p952_p0 }
  0x1c   : > { %p960_p2 = pnand %p959_p10, %p953_p3 }
  0x1e   : > { %963 = shalt.err (!%p960_p2)
}
  0x1f   : > { %s1063_s21 = smov 256   ;;  %s1064_s22 = smov 16  }
  0x20   : > { %s1342_s6 = sld [smem:[#allocation13_spill]]  ;;  %p30_p9 = scmp.eq.s32.totalorder %s29_s19, 0 }
  0x21   : > { %p39_p12 = scmp.ne.s32.totalorder %s1056_s29, %s1052_s28  ;;  %p40_p10 = scmp.eq.s32.totalorder %s1060_s30, 0 }
  0x22   : > { %p882_p2 = scmp.lt.s32.totalorder %s1060_s30, 2  ;;  %p1344_p0 = scmp.eq.s32.totalorder %s1136_s9, 1 }
  0x23   : > { %s1186_s25 = scalar_select %p30_p9, %s1056_s29, %s32_s18  }
  0x24   : > { %p41_p13 = por %p40_p10, %p39_p12  ;;  %p1190_p3 = por %p1344_p0, %p39_p12 }
  0x25   : > { %1343 = sst [smem:[#allocation12_spill]] %s1186_s25  ;;  %s277_s10 = sand.u32 1, %s1056_s29  }
  0x26   : > { %872 = dma.hbm_to_vmem [thread:$0]  (!%p1164_p11), %s1342_s6, 4096, %s261_s15, [#allocation6], %s1063_s21, %s1063_s21, %s1064_s22  }
  0x27   : > { %s1345_s26 = scalar_select %p1190_p3, 1, 0 }
  0x28   : > { %s820_s14 = sshll.u32 %s1060_s30, 7  ;;  %s819_s20 = sshll.u32 %s277_s10, 3 }
  0x29   : > { %s1199_s23 = scalar_lea.hbm %s1321_s0, %s820_s14  ;;  %s281_s15 = scalar_lea.vmem [#allocation2], %s819_s20 }
  0x2a   : > { %s288_s18 = sshll.u32 %s281_s15, 4  ;;  %p1201_p11 = pnand %p882_p2, %p41_p13  ;;  %s289_s18 = int_to_ptr.vmem [resolvable:$true] %s288_s18 }
  0x2b   : > { %s278_s21 = scalar_lea.sflag [#allocation3], %s277_s10  ;;  %s964_s22 = scalar_lea.hbm %s1199_s23, 128 }
  0x2c   : > { %p965_p5 = scmp.ne.s32.totalorder %s1199_s23, %s964_s22  ;;  %p966_p7 = pneg %p1201_p11 }
  0x2d   : > { %s969_s14 = scalar_lea.hbm %s1321_s0, 256  ;;  %p970_p10 = scmp.lt.s32.totalorder %s1199_s23, %s1321_s0 }
  0x2e   : > { %p967_p9 = pnand %p966_p7, %p965_p5  ;;  %p971_p2 = scmp.lt.s32.totalorder %s969_s14, %s964_s22 }
  0x30   : > { %p968_p12 = pneg %p967_p9  ;;  %p972_p13 = por %p971_p2, %p970_p10 }
  0x32   : > { %p973_p0 = pnand %p972_p13, %p968_p12 }
  0x34   : > { %976 = shalt.err (!%p973_p0)
}
  0x35   : > { %s977_s15 = scalar_lea.vmem %s289_s18, 128  ;;  %s1065_s10 = smov [#allocation2]  }
  0x36   : > { %p978_p1 = scmp.ne.s32.totalorder %s289_s18, %s977_s15  ;;  %s982_s6 = sshll.u32 %s1065_s10, 4  ;;  %s983_s6 = int_to_ptr.vmem [resolvable:$false] %s982_s6 }
  0x37   : > { %s984_s25 = scalar_lea.vmem %s983_s6, 256  ;;  %p985_p5 = scmp.lt.s32.totalorder %s289_s18, %s983_s6 }
  0x38   : > { %p980_p6 = pnand %p978_p1, %p966_p7  ;;  %p986_p9 = scmp.lt.s32.totalorder %s984_s25, %s977_s15 }
  0x3a   : > { %p981_p3 = pneg %p980_p6  ;;  %p987_p4 = por %p986_p9, %p985_p5 }
  0x3c   : > { %p988_p8 = pnand %p987_p4, %p981_p3 }
  0x3e   : > { %991 = shalt.err (!%p988_p8)
}
  0x3f   : > { %876 = dma.hbm_to_vmem [thread:$0]  (!%p1201_p11), %s1199_s23, 128, %s289_s18, %s278_s21  }
  0x40   : > { %p1347_p12 = scmp.ne.s32.totalorder %s1339_s13, 0 }
  0x41   : > { %s1222_s22 = sand.u32 (!%p1347_p12), 1, %s1052_s28   ;;  %p1348_p1 = scmp.ne.s32.totalorder (!%p1347_p12), %s1337_s11, 0 }
  0x42   : > { %311 = sbr.rel (%p1347_p12) target bundleno = 662 (0x296), region = 52  ;;  %s822_s17 = sshll.u32 (!%p1347_p12), %s1222_s22, 3 }
  0x43   : > { %s314_s24 = scalar_lea.sflag (!%p1347_p12), [#allocation3], %s1222_s22  ;;  %s1226_s6 = scalar_lea.vmem (!%p1347_p12), [#allocation2], %s822_s17 }
  0x47   : > { %1035 = dma.done.wait (%p1348_p1), %s314_s24, 128  }
  0x48   : > { %1037 = vsyncadd (%p1348_p1), %s314_s24, 4294967168  ;;  %p1349_p4 = scmp.eq.s32.totalorder %s1136_s9, 0 }
  0x4a   : > { %1039 = dma.done.wait (%p1349_p4), [#allocation6], 4096   ;;  %p1350_p6 = pmov %p1349_p4 }
  0x4b   : > { %p362_p8 = scmp.lt.s32.totalorder %s1136_s9, 1  ;;  %v1066_v0 = vmov 0   ;;  %v1067_v1 = vmov 0.0   ;;  %vm389_vm0 = vcmask 1043456   ;;  %vm1068_vm1 = vmmov 0   ;;  %v579_v13 = vld [vmem:[#allocation5 + $0xf8] sm:$0xff] }
  0x4c   : > { %1041 = vsyncadd (%p1350_p6), [#allocation6], 4294963200  ;;  %923 = vset.pattern.permute.xlu0 %v1066_v0  ;;  %845 = vmatprep.subr.mxu1 %v1067_v1  ;;  %v384_v4 = vld [vmem:[%s1325_s4] sm:$0xf]  ;;  %v577_v15 = vld [vmem:[#allocation5 + $0xe8] sm:$0xff]  ;;  %v372_v32 = vlaneseq  ;;  %vm385_vm2 = vcmask 31744  }
  0x4d   : > { %s363_s13 = scalar_select %p362_p8, %s1136_s9, 1  ;;  %656 = vmatprep.mubr.f32.mxu0 %v1067_v1  ;;  %847 = vmatprep.mubr.msk.f32.mxu1 %vm1068_vm1, %v1067_v1  ;;  %v578_v14 = vld [vmem:[#allocation5 + $0xf0] sm:$0xff]  ;;  %v576_v16 = vld [vmem:[#allocation5 + $0xe0] sm:$0xff]  ;;  %v575_v18 = vld [vmem:[#allocation5 + $0xd8] sm:$0xff]  ;;  %vm463_vm4 = vcmask 261120  }
  0x4e   : > { %846 = vmatpush3.msk.msra.mxu1 %vm389_vm0, %v384_v4  ;;  %592 = vmatprep.subr.mxu0 %v579_v13  ;;  %v574_v20 = vld [vmem:[#allocation5 + $0xd0] sm:$0xff]  ;;  %v573_v21 = vld [vmem:[#allocation5 + $0xc8] sm:$0xff]  ;;  %v572_v22 = vld [vmem:[#allocation5 + $0xc0] sm:$0xff]  ;;  %v373_v33 = vand.u32 127, %v372_v32  ;;  %s837_s16 = sshll.u32 %s1136_s9, 8  ;;  %p1351_p11 = scmp.ne.s32.totalorder %s1345_s26, 0 }
  0x4f   : > { %s825_s25 = sshll.u32 %s363_s13, 3  ;;  %850 = vmatprep.subr.mxu1 %v1067_v1  ;;  %593 = vmatpush1.msra.mxu0 %v578_v14  ;;  %v571_v23 = vld [vmem:[#allocation5 + $0xb8] sm:$0xff]  ;;  %v570_v24 = vld [vmem:[#allocation5 + $0xb0] sm:$0xff]  ;;  %v569_v25 = vld [vmem:[#allocation5 + $0xa8] sm:$0xff]  ;;  %s1284_s24 = scalar_lea.hbm %s1329_s8, %s837_s16 }
  0x50   : > { %s365_s18 = scalar_lea.vmem %s1322_s1, %s825_s25  ;;  %s369_s14 = scalar_lea.vmem %s1323_s2, %s825_s25  ;;  %594 = vmatprep.subr.mxu0 %v577_v15  ;;  %v568_v26 = vld [vmem:[#allocation5 + $0xa0] sm:$0xff]  ;;  %v567_v27 = vld [vmem:[#allocation5 + $0x98] sm:$0xff]  ;;  %v566_v28 = vld [vmem:[#allocation5 + $0x90] sm:$0xff] }
  0x51   : > { %v371_v2 = vld [vmem:[%s365_s18] sm:$0xff]  ;;  %595 = vmatpush1.msra.mxu0 %v576_v16  ;;  %v565_v29 = vld [vmem:[#allocation5 + $0x88] sm:$0xff]  ;;  %v564_v30 = vld [vmem:[#allocation5 + $0x80] sm:$0xff]  ;;  %s697_s13 = scalar_lea.sflag [#allocation4], %s1222_s22  ;;  %s1069_s11 = smov [#allocation7]  }
  0x52   : > { %v663_v3 = vld [vmem:[%s369_s14] sm:$0xff]  ;;  %375 = vperm.xlu0 %923, %v371_v2   ;;  %596 = vmatprep.subr.mxu0 %v575_v18  ;;  %v563_v31 = vld [vmem:[#allocation5 + $0x78] sm:$0xff]  ;;  %v383_v35 = vld [vmem:[%s1324_s3 + $0x18] sm:$0xff]  ;;  %s824_s14 = sshll.u32 %s1222_s22, 4  ;;  %s996_s9 = sshll.u32 %s1069_s11, 4  ;;  %s997_s9 = int_to_ptr.vmem [resolvable:$false] %s996_s9 }
  0x53   : > { %v664_v5 = vmul.f32 1.442695, %v663_v3  ;;  %597 = vmatpush1.msra.mxu0 %v574_v20  ;;  %v382_v37 = vld [vmem:[%s1324_s3 + $0x10] sm:$0xff]  ;;  %v381_v38 = vld [vmem:[%s1324_s3 + $0x8] sm:$0xff]  ;;  %v380_v39 = vld [vmem:[%s1324_s3] sm:$0xff]  ;;  %s361_s20 = scalar_lea.vmem [#allocation7], %s824_s14 }
  0x54   : > { %598 = vmatprep.subr.mxu0 %v573_v21  ;;  %v370_v40 = vld [vmem:[%s1226_s6] sm:$0xff]  ;;  %v561_v42 = vld [vmem:[#allocation5 + $0x68] sm:$0xff]  ;;  %v560_v43 = vld [vmem:[#allocation5 + $0x60] sm:$0xff]  ;;  %s711_s15 = sshll.u32 %s361_s20, 4  ;;  %s998_s23 = scalar_lea.vmem %s997_s9, 512  ;;  %s712_s15 = int_to_ptr.vmem [resolvable:$true] %s711_s15 }
  0x55   : > { %924 = vpow2.f32 %v664_v5  ;;  %599 = vmatpush1.msra.mxu0 %v572_v22  ;;  %v562_v41 = vld [vmem:[#allocation5 + $0x70] sm:$0xff]  ;;  %v559_v44 = vld [vmem:[#allocation5 + $0x58] sm:$0xff]  ;;  %v557_v46 = vld [vmem:[#allocation5 + $0x48] sm:$0xff]  ;;  %s992_s25 = scalar_lea.vmem %s712_s15, 256  ;;  %p999_p2 = scmp.lt.s32.totalorder %s712_s15, %s997_s9 }
  0x56   : > { %600 = vmatprep.subr.mxu0 %v571_v23  ;;  %v558_v45 = vld [vmem:[#allocation5 + $0x50] sm:$0xff]  ;;  %v556_v47 = vld [vmem:[#allocation5 + $0x40] sm:$0xff]  ;;  %v555_v48 = vld [vmem:[#allocation5 + $0x38] sm:$0xff]  ;;  %p993_p3 = scmp.ne.s32.totalorder %s712_s15, %s992_s25  ;;  %p1000_p13 = scmp.lt.s32.totalorder %s998_s23, %s992_s25 }
  0x57   : > { %601 = vmatpush1.msra.mxu0 %v570_v24  ;;  %v554_v49 = vld [vmem:[#allocation5 + $0x30] sm:$0xff]  ;;  %v553_v50 = vld [vmem:[#allocation5 + $0x28] sm:$0xff]  ;;  %v552_v51 = vld [vmem:[#allocation5 + $0x20] sm:$0xff] }
  0x58   : > { %602 = vmatprep.subr.mxu0 %v569_v25  ;;  %v551_v52 = vld [vmem:[#allocation5 + $0x18] sm:$0xff]  ;;  %v550_v53 = vld [vmem:[#allocation5 + $0x10] sm:$0xff]  ;;  %v549_v54 = vld [vmem:[#allocation5 + $0x8] sm:$0xff]  ;;  %p994_p7 = pnand %p993_p3, %p1351_p11  ;;  %p1001_p0 = por %p1000_p13, %p999_p2 }
  0x59   : > { %603 = vmatpush1.msra.mxu0 %v568_v26  ;;  %v548_v55 = vld [vmem:[#allocation5] sm:$0xff]  ;;  %v831_v59 = vld [vmem:[%s1326_s5] ss:$0 sm:$0xff] }
  0x5a   : > { %604 = vmatprep.subr.mxu0 %v567_v27  ;;  %v580_v3 = vld [vmem:[%s1328_s7] sm:$0x3]  ;;  %p995_p10 = pneg %p994_p7 }
  0x5b   : > { %605 = vmatpush1.msra.mxu0 %v566_v28 }
  0x5c   : > { %606 = vmatprep.subr.mxu0 %v565_v29  ;;  %p1002_p5 = pnand %p1001_p0, %p995_p10 }
  0x5d   : > { %607 = vmatpush1.msra.mxu0 %v564_v30 }
  0x5e   : > { %608 = vmatprep.subr.mxu0 %v563_v31 }
  0x5f   : > { %609 = vmatpush1.msra.mxu0 %v562_v41 }
  0x60   : > { %610 = vmatprep.subr.mxu0 %v561_v42 }
  0x61   : > { %611 = vmatpush1.msra.mxu0 %v560_v43 }
  0x62   : > { %v925_v6 = vpop.eup %924  ;;  %612 = vmatprep.subr.mxu0 %v559_v44 }
  0x63   : > { %v667_v7 = vmul.f32 0.00390625, %v925_v6  ;;  %613 = vmatpush1.msra.mxu0 %v558_v45 }
  0x64   : > { %614 = vmatprep.subr.mxu0 %v557_v46 }
  0x65   : > { %v668_v8 = vmax.f32 %v667_v7, 1e-07  ;;  %615 = vmatpush1.msra.mxu0 %v556_v47 }
  0x66   : > { %616 = vmatprep.subr.mxu0 %v555_v48 }
  0x67   : > { %v669_v9 = vmin.f32 %v668_v8, 0.9999999  ;;  %617 = vmatpush1.msra.mxu0 %v554_v49 }
  0x68   : > { %618 = vmatprep.subr.mxu0 %v553_v50 }
  0x69   : > { %v670_v10 = vsub.f32 1.0, %v669_v9  ;;  %619 = vmatpush1.msra.mxu0 %v552_v51 }
  0x6a   : > { %620 = vmatprep.subr.mxu0 %v551_v52 }
  0x6b   : > { %926 = vrcp.f32 %v670_v10  ;;  %621 = vmatpush1.msra.mxu0 %v550_v53 }
  0x6c   : > { %622 = vmatprep.subr.mxu0 %v549_v54 }
  0x6d   : > { %623 = vmatpush1.msra.mxu0 %v548_v55 }
  0x78   : > { %v927_v11 = vpop.eup %926 }
  0x79   : > { %v672_v12 = vmul.f32 %v927_v11, %v669_v9 }
  0x7b   : > { %928 = vlog2.f32 %v672_v12 }
  0x88   : > { %v929_v17 = vpop.eup %928 }
  0x89   : > { %v674_v19 = vmul.f32 0.6931472, %v929_v17 }
  0x8b   : > { %677 = vperm.xlu0 %923, %v674_v19  }
  0xcd   : > { %v376_v34 = vpop.permute.xlu0 %375 }
  0xce   : > { %vm377_vm3 = vcmp.eq.s32.totalorder %v373_v33, %v376_v34 }
  0xcf   : > { %v827_v36 = vsel %vm377_vm3, 1.0, %v1067_v1 }
  0xd0   : > { %848 = vmatmul.mubr.msk.f32.vlgmr.msra.gmra.mxu1 %vm385_vm2, %v827_v36 }
  0xd1   : > { %851 = vmatpush3.msra.mxu1 %v383_v35  ;;  %858 = vmatprep.mubr.msk.f32.mxu1 %vm1068_vm1, %v1067_v1 }
  0xd2   : > { %852 = vmatprep.subr.mxu1 %v1067_v1 }
  0xd3   : > { %853 = vmatpush3.msra.mxu1 %v382_v37 }
  0xd4   : > { %854 = vmatprep.subr.mxu1 %v1067_v1 }
  0xd5   : > { %855 = vmatpush3.msra.mxu1 %v381_v38 }
  0xd6   : > { %856 = vmatprep.subr.mxu1 %v1067_v1  ;;  %v583_v1 = vshrl.u32 %v372_v32, 7 }
  0xd7   : > { %857 = vmatpush3.msra.mxu1 %v380_v39 }
  0xd8   : > { %859 = vmatmul.mubr.msk.f32.vlgmr.msra.gmra.mxu1 %vm463_vm4, %v370_v40  ;;  %v584_v2 = vsub.s32 0, %v583_v1  ;;  %v588_v4 = vsub.s32 1, %v583_v1 }
  0xda   : > { %v585_v5 = vrot.slane %v580_v3, %v584_v2  ;;  %v589_v6 = vrot.slane %v580_v3, %v588_v4 }
 0x106   : > { %v678_v9 = vpop.permute.xlu0 %677 }
 0x190   : > { %v459_v56 = vpop.f32.mrf.mxu1 }
 0x192   : > { %v849_v57 = vpop.f32.mrf.mxu1 }
 0x198   : > { %v533_v58 = vpop.f32.mrf.mxu1 }
 0x199   : > { %v534_v60 = vadd.f32 %v533_v58, %v459_v56 }
 0x19a   : > { %v860_v61 = vpop.f32.mrf.mxu1 }
 0x19b   : > { %v544_v62 = vadd.f32 %v831_v59, %v534_v60 }
 0x19d   : > { %vm545_vm5 = vcmp.gt.f32.partialorder %v544_v62, 0.0  ;;  %v546_v63 = vmul.f32 0.01, %v544_v62 }
 0x19f   : > { %v547_v0 = vsel %vm545_vm5, %v544_v62, %v546_v63 }
 0x1a0   : > { %657 = vmatmul.mubr.f32.vlgmr.msra.gmra.mxu0 %v547_v0 }
 0x260   : > { %v658_v7 = vpop.f32.mrf.mxu0 }
 0x261   : > { %v659_v8 = vadd.f32 %v658_v7, %v585_v5 }
 0x262   : > { %v660_v10 = vpop.f32.mrf.mxu0 }
 0x263   : > { %v680_v11 = vadd.f32 %v678_v9, %v659_v8  ;;  %v661_v12 = vadd.f32 %v660_v10, %v589_v6 }
 0x265   : > { %v682_v13 = vsub.f32 0.0, %v680_v11  ;;  %v681_v14 = vadd.f32 %v678_v9, %v661_v12 }
 0x267   : > { %v684_v15 = vmul.f32 1.442695, %v682_v13  ;;  %v683_v16 = vsub.f32 0.0, %v681_v14 }
 0x269   : > { %930 = vpow2.f32 %v684_v15  ;;  %v686_v17 = vmul.f32 1.442695, %v683_v16 }
 0x26b   : > { %932 = vpow2.f32 %v686_v17 }
 0x276   : > { %v931_v18 = vpop.eup %930 }
 0x277   : > { %v688_v19 = vadd.f32 1.0, %v931_v18 }
 0x278   : > { %v933_v20 = vpop.eup %932 }
 0x279   : > { %934 = vrcp.f32 %v688_v19  ;;  %v689_v21 = vadd.f32 1.0, %v933_v20 }
 0x27b   : > { %936 = vrcp.f32 %v689_v21 }
 0x286   : > { %v935_v22 = vpop.eup %934 }
 0x287   : > { %694 = vst [vmem:[%s361_s20] sm:$0xff] %v935_v22 }
 0x288   : > { %v937_v23 = vpop.eup %936 }
 0x289   : > { %695 = vst [vmem:[%s361_s20 + $0x8] sm:$0xff] %v937_v23 }
 0x28a   : > { %1005 = shalt.err (!%p1002_p5)
}
 0x28b   : > { %s1006_s6 = scalar_lea.hbm %s1284_s24, 256  ;;  %s1010_s19 = scalar_lea.hbm %s1329_s8, 512 }
 0x28c   : > { %p1007_p9 = scmp.ne.s32.totalorder %s1284_s24, %s1006_s6  ;;  %p1011_p4 = scmp.lt.s32.totalorder %s1284_s24, %s1329_s8 }
 0x28d   : > { %p1012_p6 = scmp.lt.s32.totalorder %s1010_s19, %s1006_s6 }
 0x28e   : > { %p1008_p12 = pnand %p1007_p9, %p1351_p11 }
 0x28f   : > { %p1013_p8 = por %p1012_p6, %p1011_p4 }
 0x290   : > { %p1009_p1 = pneg %p1008_p12 }
 0x292   : > { %p1014_p3 = pnand %p1013_p8, %p1009_p1 }
 0x294   : > { %1017 = shalt.err (!%p1014_p3)
}
 0x295   : > { %867 = dma.vmem_to_hbm [thread:$0]  (%p1351_p11), %s712_s15, 256, %s1284_s24, %s697_s13  }
 0x296 PF: > { %s723_s16 = sand.u32 1, %s1048_s27   ;;  %p1352_p7 = scmp.ne.s32.totalorder %s1338_s12, 0 }
 0x297   : > { %p1353_p10 = scmp.ge.s32.totalorder %s1060_s30, 2  ;;  %s724_s20 = scalar_lea.sflag [#allocation4], %s723_s16 }
 0x299   : > { %p878_p2 = pnand %p1353_p10, %p1352_p7 }
 0x29b   : > { %p879_p13 = pneg %p878_p2 }
 0x29d   : > { %1043 = dma.done.wait (%p879_p13), %s724_s20, 256  }
 0x29e   : > { %1045 = vsyncadd (%p879_p13), %s724_s20, 4294967040  ;;  %s1354_s30 = sld [smem:[#allocation11_spill]]  ;;  %s1356_s27 = smov %s1052_s28 }
 0x29f   : > { %s1355_s10 = sld [smem:[#allocation12_spill]]  ;;  %s1357_s28 = smov %s1056_s29 }
 0x2a4   : > { %p22_p0 = scmp.ge.s32.totalorder %s1354_s30, 4  }
 0x2a5   : > { %s1358_s29 = smov %s1355_s10 }
 0x2a6   :  { %24 = sbr.rel (!%p22_p0) target bundleno = 8 (0x8), region = 107 }
 0x2ab   :  { %729 = vsyncpa [#allocation3], 1 }
 0x2ac   :  { %731 = vsyncpa [#allocation3 + $0x1], 1 }
 0x2ad   :  { %732 = vsyncpa [#allocation6], 1 }
 0x2ae   :  { %733 = vsyncpa [#allocation4], 1 }
 0x2af   :  { %735 = vsyncpa [#allocation4 + $0x1], 1 }

</bundles_post_ra>
